<compile_context>
chip_gen: v7x
topology: tpu7x:2x2x1
jax: 0.10.0
libtpu: 0.0.40
codegen_flags: <defaults>
</compile_context>

<pallas_src>
import functools

import numpy as np
import jax
import jax.numpy as jnp
from jax.experimental import pallas as pl
from jax.experimental.pallas import tpu as pltpu


def _unigram_kernel(logp_ref, x_ref, o_ref, acc_ref):
    # logp_ref: (TV, 1)  f32   -- log-probability slice for this V block
    # x_ref:    (TV, TN)       -- input tile (V on sublanes, tokens on lanes)
    # o_ref:    (8, 128) f32   -- per-V-block partial (scalar, broadcast)
    # acc_ref:  (TV, 128) f32  -- lane-folded running token-count accumulator
    j = pl.program_id(1)

    tn = x_ref.shape[1]
    n_chunks = tn // 128  # static (tn is a multiple of 128, enforced in wrapper)

    # Fold the tile's lanes down to 128: static lane-aligned slabs, pure VPU
    # adds (no XLU, no layout change).
    folded = x_ref[:, 0:128].astype(jnp.float32)
    for c in range(1, n_chunks):
        folded = folded + x_ref[:, c * 128:(c + 1) * 128].astype(jnp.float32)

    @pl.when(j == 0)
    def _first():
        acc_ref[...] = folded

    @pl.when(j > 0)
    def _steady():
        acc_ref[...] += folded

    @pl.when(j == pl.num_programs(1) - 1)
    def _finalize():
        # sum_v counts_v * logp_v == sum over the folded accumulator of
        # acc * logp (logp broadcast along the 128 lanes).  Single XLU reduce
        # per V block, epilogue only.
        partial = jnp.sum(acc_ref[...] * logp_ref[...])
        o_ref[...] = jnp.broadcast_to(partial.reshape(1, 1), o_ref.shape)


def _pick_tile(dim: int, target: int, align: int) -> int:
    """Largest multiple of `align` that divides `dim` and is <= target.
    Falls back to the full dimension (always a legal block) otherwise."""
    if dim % align != 0:
        return dim
    cand = min(dim, max(align, (target // align) * align))
    while dim % cand != 0:
        cand -= align
    return cand


@functools.partial(jax.jit, static_argnames=("tv", "tn"))
def unigram_forward(s: jax.Array, x: jax.Array, *, tv=None, tn=None) -> jax.Array:
    V, one = s.shape
    assert one == 1
    Vx, N = x.shape
    assert Vx == V

    # Tile sizes.  tv is capped at V//2 so the 'parallel' V axis spans >= 2
    # blocks (keeps both v7x TensorCores busy); tn target 2048 keeps
    # 2 x (tile bytes) + (tv,128) accumulator comfortably inside scoped VMEM
    # on every generation even for f32 inputs.
    if tv is None:
        tv = _pick_tile(V, min(512, max(8, V // 2)), 8)
    if tn is None:
        tn = _pick_tile(N, 2048, 128)
    assert V % tv == 0 and N % tn == 0
    assert tn % 128 == 0, "token tile must be a multiple of 128 lanes"
    gv, gn = V // tv, N // tn

    # logp over the tiny parameter vector (V floats) in plain JAX -- stable
    # log_sigmoid, no divide, no log(0).  Everything touching the (V, N) data
    # stays inside the kernel.
    s32 = s.astype(jnp.float32)
    logz = jnp.log(jnp.sum(jax.nn.sigmoid(s32)))
    logp = jax.nn.log_sigmoid(s32) - logz                     # (V, 1) f32

    grid_spec = pltpu.PrefetchScalarGridSpec(
        num_scalar_prefetch=0,
        grid=(gv, gn),
        in_specs=[
            pl.BlockSpec((tv, 1), lambda i, j: (i, 0)),       # logp block
            pl.BlockSpec((tv, tn), lambda i, j: (i, j)),      # x tile
        ],
        out_specs=pl.BlockSpec((8, 128), lambda i, j: (i, 0)),
        scratch_shapes=[pltpu.VMEM((tv, 128), jnp.float32)],  # lane-folded acc
    )

    partials = pl.pallas_call(
        _unigram_kernel,
        out_shape=jax.ShapeDtypeStruct((gv * 8, 128), jnp.float32),
        grid_spec=grid_spec,
        compiler_params=pltpu.CompilerParams(
            dimension_semantics=("parallel", "arbitrary"),
            vmem_limit_bytes=64 << 20),
    )(logp, x)

    # Each V block wrote its partial scalar broadcast over an (8, 128) block.
    per_block = partials.reshape(gv, 8, 128)[:, 0, 0]
    return jnp.sum(per_block).reshape(1, 1)


def init_unigram_param(V: int) -> jax.Array:
    # s0 = logit(1/V) for every entry, matching the PyTorch __init__.
    p0 = np.ones((V, 1), dtype=np.float64) / V
    s0 = np.log(p0) - np.log(1.0 - p0)
    return jnp.asarray(s0.astype(np.float32))


if __name__ == "__main__":
    V = 256   # vocabulary size
    N = 512   # number of tokens in the example "document"

    # Deterministic parameter init (from the module's __init__).
    s = init_unigram_param(V)

    # Deterministic example input: one-hot token matrix of shape (V, N),
    # built directly in bf16 (0/1 values are exact) -- halves HBM traffic of
    # this bandwidth-bound kernel versus f32.
    key = jax.random.PRNGKey(0)
    tokens = jax.random.randint(key, (N,), 0, V)
    x = jax.nn.one_hot(tokens, V, dtype=jnp.bfloat16).T      # (V, N) bf16

    # Small explicit tiles so even this toy size exercises a (2, 2) grid
    # (parallel V axis + 'arbitrary' token reduction axis) and the in-kernel
    # lane folding (tn=256 -> 2 slabs per step).
    out = unigram_forward(s, x, tv=128, tn=256)
    out = jax.block_until_ready(out)

    # Reference check in plain JAX (same math as the PyTorch module).
    sig = jax.nn.sigmoid(s)
    p = sig / jnp.sum(sig)
    x_f32 = x.astype(jnp.float32)
    ref = jnp.sum(x_f32, axis=1, keepdims=True).T @ jnp.log(p)
    assert out.shape == (1, 1)
    np.testing.assert_allclose(np.asarray(out), np.asarray(ref), rtol=1e-5, atol=1e-4)

    print("KERNEL_OK")
</pallas_src>

<mosaic_0001>
module attributes {stable_mosaic.version = 11 : i64} {
  func.func @_unigram_kernel(%arg0: i32, %arg1: i32, %arg2: memref<128x1xf32, #tpu.memory_space<vmem>>, %arg3: memref<128x256xbf16, #tpu.memory_space<vmem>>, %arg4: memref<8x128xf32, #tpu.memory_space<vmem>>, %arg5: memref<128x128xf32, #tpu.memory_space<vmem>>) attributes {dimension_semantics = [#tpu.dimension_semantics<parallel>, #tpu.dimension_semantics<arbitrary>], iteration_bounds = array<i64: 2, 2>, scalar_prefetch = 0 : i64, scratch_operands = 1 : i64, tpu.core_type = #tpu.core_type<tc>, window_params = [{transform_indices = @transform_0, window_bounds = array<i64: 128, 1>}, {transform_indices = @transform_1, window_bounds = array<i64: 128, 256>}, {transform_indices = @transform_2, window_bounds = array<i64: 8, 128>}]} {
    %c0 = arith.constant 0 : index
    %c0_0 = arith.constant 0 : index
    %0 = vector.load %arg3[%c0, %c0_0] : memref<128x256xbf16, #tpu.memory_space<vmem>>, vector<128x128xbf16>
    %1 = arith.extf %0 : vector<128x128xbf16> to vector<128x128xf32>
    %c0_1 = arith.constant 0 : index
    %c128 = arith.constant 128 : index
    %2 = vector.load %arg3[%c0_1, %c128] : memref<128x256xbf16, #tpu.memory_space<vmem>>, vector<128x128xbf16>
    %3 = arith.extf %2 : vector<128x128xbf16> to vector<128x128xf32>
    %4 = arith.addf %1, %3 : vector<128x128xf32>
    %c0_i32 = arith.constant 0 : i32
    %5 = arith.cmpi eq, %arg1, %c0_i32 : i32
    %6 = arith.extui %5 : i1 to i32
    %c0_i32_2 = arith.constant 0 : i32
    %7 = arith.cmpi ne, %6, %c0_i32_2 : i32
    scf.if %7 {
      %c0_6 = arith.constant 0 : index
      %c0_7 = arith.constant 0 : index
      %14 = vector.load %arg5[%c0_6, %c0_7] : memref<128x128xf32, #tpu.memory_space<vmem>>, vector<128x128xf32>
      tpu.vector_store %arg5[%c0_6, %c0_7], %4 {strides = array<i32>} : memref<128x128xf32, #tpu.memory_space<vmem>>, vector<128x128xf32>,
    } else {
    }
    %c0_i32_3 = arith.constant 0 : i32
    %8 = arith.cmpi sgt, %arg1, %c0_i32_3 : i32
    %9 = arith.extui %8 : i1 to i32
    %c0_i32_4 = arith.constant 0 : i32
    %10 = arith.cmpi ne, %9, %c0_i32_4 : i32
    scf.if %10 {
      %c0_6 = arith.constant 0 : index
      %c0_7 = arith.constant 0 : index
      %14 = vector.load %arg5[%c0_6, %c0_7] : memref<128x128xf32, #tpu.memory_space<vmem>>, vector<128x128xf32>
      %15 = arith.addf %14, %4 : vector<128x128xf32>
      %c0_8 = arith.constant 0 : index
      %c0_9 = arith.constant 0 : index
      %16 = vector.load %arg5[%c0_8, %c0_9] : memref<128x128xf32, #tpu.memory_space<vmem>>, vector<128x128xf32>
      tpu.vector_store %arg5[%c0_8, %c0_9], %15 {strides = array<i32>} : memref<128x128xf32, #tpu.memory_space<vmem>>, vector<128x128xf32>,
    } else {
    }
    %c1_i32 = arith.constant 1 : i32
    %11 = arith.cmpi eq, %arg1, %c1_i32 : i32
    %12 = arith.extui %11 : i1 to i32
    %c0_i32_5 = arith.constant 0 : i32
    %13 = arith.cmpi ne, %12, %c0_i32_5 : i32
    scf.if %13 {
      %c0_6 = arith.constant 0 : index
      %c0_7 = arith.constant 0 : index
      %14 = vector.load %arg5[%c0_6, %c0_7] : memref<128x128xf32, #tpu.memory_space<vmem>>, vector<128x128xf32>
      %c0_8 = arith.constant 0 : index
      %c0_9 = arith.constant 0 : index
      %15 = vector.load %arg2[%c0_8, %c0_9] : memref<128x1xf32, #tpu.memory_space<vmem>>, vector<128x1xf32>
      %16 = vector.broadcast %15 : vector<128x1xf32> to vector<128x128xf32>
      %17 = arith.mulf %14, %16 : vector<128x128xf32>
      %18 = vector.shape_cast %17 : vector<128x128xf32> to vector<1x128x128xf32>
      %cst = arith.constant dense<0.000000e+00> : vector<1xf32>
      %19 = vector.multi_reduction <add>, %18, %cst [1, 2] : vector<1x128x128xf32> to vector<1xf32>
      %20 = vector.shape_cast %19 : vector<1xf32> to vector<1x1x1xf32>
      %21 = vector.extract %20[0, 0, 0] : f32 from vector<1x1x1xf32>
      %22 = vector.broadcast %21 : f32 to vector<1x1xf32>
      %23 = vector.shape_cast %22 : vector<1x1xf32> to vector<1x1xf32>
      %24 = vector.broadcast %23 : vector<1x1xf32> to vector<8x128xf32>
      %c0_10 = arith.constant 0 : index
      %c0_11 = arith.constant 0 : index
      %25 = vector.load %arg4[%c0_10, %c0_11] : memref<8x128xf32, #tpu.memory_space<vmem>>, vector<8x128xf32>
      tpu.vector_store %arg4[%c0_10, %c0_11], %24 {strides = array<i32>} : memref<8x128xf32, #tpu.memory_space<vmem>>, vector<8x128xf32>,
    } else {
    }
    return
  }
  func.func @transform_0(%arg0: i32, %arg1: i32) -> (i32, i32) {
    %c0_i32 = arith.constant 0 : i32
    %c0_i32_0 = arith.constant 0 : i32
    return %arg0, %c0_i32 : i32, i32
  }
  func.func @transform_1(%arg0: i32, %arg1: i32) -> (i32, i32) {
    %c0_i32 = arith.constant 0 : i32
    return %arg0, %arg1 : i32, i32
  }
  func.func @transform_2(%arg0: i32, %arg1: i32) -> (i32, i32) {
    %c0_i32 = arith.constant 0 : i32
    %c0_i32_0 = arith.constant 0 : i32
    return %arg0, %c0_i32 : i32, i32
  }
}

</mosaic_0001>

<bundles_post_ra>
// kernel: unigram_forward.1
= control target key start
LH: loop header
LB: loop body
LE: loop exit
PB: predicated region body
PF: predicated region fallthrough
CT: control target
= control target key end

     0   :  { %s1358_s0 = inlined_call_operand.hbm [shape: f32[256,1], index: 0, kind: input, shape index: {}]   ;;  %s1359_s1 = inlined_call_operand.hbm [shape: bf16[256,512], index: 1, kind: input, shape index: {}]   ;;  %s1360_s2 = inlined_call_operand.hbm [shape: f32[16,128], index: 2, kind: output, shape index: {}]  }
   0x1   :  { %1375 = sst [smem:[#allocation18_spill]] %s1358_s0 }
   0x2   :  { %1376 = sst [smem:[#allocation19_spill]] %s1360_s2 }
   0x3   :  { %7 = vsyncpa [#allocation4], 0 }
   0x4   :  { %9 = vsyncpa [#allocation4 + $0x1], 0 }
   0x5   :  { %10 = vsyncpa [#allocation7], 0 }
   0x6   :  { %12 = vsyncpa [#allocation7 + $0x1], 0 }
   0x7   :  { %13 = vsyncpa [#allocation5], 0 }
   0x8   :  { %15 = vsyncpa [#allocation5 + $0x1], 0  ;;  %s1003_s9 = smov 0   ;;  %s1005_s10 = smov 0  }
   0x9   :  { %s1007_s11 = smov 0   ;;  %s1009_s12 = smov 0  }
   0xa   :  { %s1011_s13 = smov 0   ;;  %s1013_s14 = smov 0  }
   0xb   :  { %s1015_s15 = smov 0   ;;  %s1017_s16 = smov 0  }
   0xc   :  { %s1019_s17 = smov 0   ;;  %s1021_s18 = smov 0  }
   0xd   :  { %s1023_s19 = smov 0  }
   0xe LB: > { %1377 = sst [smem:[#allocation12_spill]] %s951_s12  ;;  %s653_s20 = sadd.s32 4294967295, %s979_s19   ;;  %s979_s19 = sphi %s1023_s19, %s21_s19   ;;  %s975_s18 = sphi %s1021_s18, %s1416_s18   ;;  %s971_s17 = sphi %s1019_s17, %s1408_s17   ;;  %s967_s16 = sphi %s1017_s16, %s1415_s16   ;;  %s963_s15 = sphi %s1015_s15, %s1407_s15   ;;  %s959_s14 = sphi %s1013_s14, %s1414_s14   ;;  %s955_s13 = sphi %s1011_s13, %s1413_s13   ;;  %s951_s12 = sphi %s1009_s12, %s1412_s12   ;;  %s947_s11 = sphi %s1007_s11, %s1411_s11   ;;  %s943_s10 = sphi %s1005_s10, %s1410_s10   ;;  %s939_s9 = sphi %s1003_s9, %s1409_s9  }
   0xf   : > { %1378 = sst [smem:[#allocation13_spill]] %s967_s16  ;;  %s654_s21 = sadd.s32 4294967294, %s979_s19  }
  0x10   : > { %1379 = sst [smem:[#allocation14_spill]] %s971_s17  ;;  %s33_s22 = sadd.s32 1, %s975_s18 }
  0x11   : > { %s40_s23 = sadd.s32 1, %s959_s14  ;;  %p47_p0 = scmp.ne.s32.totalorder %s959_s14, %s955_s13 }
  0x12   : > { %p1362_p1 = scmp.eq.s32.totalorder %s979_s19, 0  ;;  %p53_p2 = scmp.ne.s32.totalorder %s955_s13, %s951_s12 }
  0x13   : > { %p1067_p3 = scmp.eq.s32.totalorder %s653_s20, 0  ;;  %p105_p5 = scmp.eq.s32.totalorder %s653_s20, 3 }
  0x14   : > { %p1073_p4 = por %p1362_p1, %p47_p0  ;;  %p111_p7 = scmp.eq.s32.totalorder %s654_s21, 3 }
  0x15   : > { %p1079_p6 = por %p1067_p3, %p53_p2  ;;  %p1083_p8 = por %p105_p5, %p47_p0 }
  0x16   : > { %p1087_p9 = por %p111_p7, %p53_p2  ;;  %p1361_p10 = scmp.lt.s32.totalorder %s979_s19, 4 }
  0x17   : > { %s1382_s26 = scalar_select %p1079_p6, 1, 0 }
  0x18   : > { %s1383_s27 = scalar_select %p1083_p8, 1, 0 }
  0x19   : > { %s1385_s28 = scalar_select %p1087_p9, 1, 0 }
  0x1a   : > { %1384 = sst [smem:[#allocation15_spill]] %s1383_s27  ;;  %s131_s29 = sand.u32 1, %s959_s14  }
  0x1b   : > { %1386 = sst [smem:[#allocation16_spill]] %s1385_s28  ;;  %s676_s30 = sshll.u32 %s975_s18, 11 }
  0x1c   : > { %s657_s3 = sshll.u32 %s131_s29, 7  ;;  %s1387_s0 = sld [smem:[#allocation18_spill]] }
  0x1d   : > { %s135_s7 = scalar_lea.vmem [#allocation3], %s657_s3  ;;  %p1103_p11 = pnand %p1361_p10, %p1073_p4 }
  0x1e   : > { %s142_s8 = sshll.u32 %s135_s7, 4  ;;  %s1109_s21 = scalar_lea.sflag [#allocation4], %s131_s29  ;;  %s1107_s8 = int_to_ptr.vmem [resolvable:$true] %s142_s8 }
  0x1f   : > { %p795_p13 = pneg %p1103_p11 }
  0x22   : > { %s1097_s6 = scalar_lea.hbm %s1387_s0, %s676_s30  ;;  %s798_s4 = scalar_lea.hbm %s1387_s0, 4096 }
  0x23   : > { %s793_s30 = scalar_lea.hbm %s1097_s6, 2048  ;;  %p799_p4 = scmp.lt.u32.totalorder %s1097_s6, %s1387_s0 }
  0x24   : > { %p794_p12 = scmp.ne.s32.totalorder %s1097_s6, %s793_s30  ;;  %p800_p5 = scmp.lt.u32.totalorder %s798_s4, %s793_s30 }
  0x25   : > { %p802_p10 = scmp.lt.u32.totalorder %s793_s30, %s1097_s6 }
  0x26   : > { %p796_p0 = pnand %p795_p13, %p794_p12  ;;  %p801_p7 = por %p800_p5, %p799_p4 }
  0x28   : > { %p797_p2 = pneg %p796_p0  ;;  %p803_p1 = por %p802_p10, %p801_p7 }
  0x2a   : > { %p804_p9 = pnand %p803_p1, %p797_p2 }
  0x2c   : > { %807 = shalt.err (!%p804_p9)
}
  0x2d   : > { %s808_s29 = scalar_lea.vmem %s1107_s8, 2048  ;;  %s981_s25 = smov [#allocation3]  }
  0x2e   : > { %p809_p12 = scmp.ne.s32.totalorder %s1107_s8, %s808_s29  ;;  %s813_s3 = sshll.u32 %s981_s25, 4  ;;  %s814_s3 = int_to_ptr.vmem [resolvable:$false] %s813_s3 }
  0x2f   : > { %s815_s5 = scalar_lea.vmem %s814_s3, 4096  ;;  %p816_p6 = scmp.lt.s32.totalorder %s1107_s8, %s814_s3 }
  0x30   : > { %p811_p0 = pnand %p809_p12, %p795_p13  ;;  %p817_p4 = scmp.lt.s32.totalorder %s815_s5, %s808_s29 }
  0x32   : > { %p812_p8 = pneg %p811_p0  ;;  %p818_p5 = por %p817_p4, %p816_p6 }
  0x34   : > { %p819_p10 = pnand %p818_p5, %p812_p8 }
  0x36   : > { %822 = shalt.err (!%p819_p10)
}
  0x37   : > { %s1365_s30 = smov 128   ;;  %s1366_s4 = smov 8  }
  0x38   : > { %689 = dma.hbm_to_vmem [thread:$0]  (!%p1103_p11), %s1097_s6, 2048, %s1107_s8, %s1109_s21, %s1365_s30, %s1365_s30, %s1366_s4  }
  0x39   : > { %p665_p1 = scmp.ge.s32.totalorder %s979_s19, 1  ;;  %p174_p6 = scmp.lt.s32.totalorder %s979_s19, 5 }
  0x3a   : > { %s30_s29 = sadd.s32 1, %s971_s17  ;;  %s68_s25 = sadd.s32 1, %s947_s11 }
  0x3b   : > { %p1142_p8 = pnand %p665_p1, %p174_p6  ;;  %p31_p9 = scmp.ge.s32.totalorder %s30_s29, 2 }
  0x3c   : > { %p75_p13 = scmp.ne.s32.totalorder %s947_s11, %s943_s10  ;;  %p81_p2 = scmp.ne.s32.totalorder %s943_s10, %s939_s9 }
  0x3d   : > { %s1418_s29 = smov (%p31_p9, %s30_s29), 0  ;;  %s1420_s22 = smov (!%p31_p9, %s33_s22), %s975_s18 }
  0x3e   : > { %1390 = sst [smem:[#allocation17_spill]] %s1418_s29  ;;  %s64_s6 = ssub.s32 %s971_s17, %s1418_s29 }
  0x3f   : > { %p1391_p11 = scmp.eq.s32.totalorder %s979_s19, 0  ;;  %p35_p12 = scmp.ge.s32.totalorder %s1420_s22, 2 }
  0x40   : > { %p1167_p0 = por %p81_p2, %p1067_p3  ;;  %s152_s9 = sand.u32 1, %s947_s11  }
  0x41   : > { %p1161_p7 = por %p75_p13, %p1391_p11  ;;  %s662_s21 = sshll.u32 %s971_s17, 1 }
  0x42   : > { %s1393_s20 = scalar_select %p1167_p0, 1, 0 }
  0x43   : > { %s1422_s22 = smov (%p35_p12, %s1420_s22), 0  ;;  %s660_s3 = sshll.u32 %s152_s9, 7 }
  0x44   : > { %s37_s5 = ssub.s32 %s975_s18, %s1422_s22  ;;  %s677_s4 = sshll.u32 %s975_s18, 6 }
  0x45   : > { %p38_p4 = scmp.eq.s32.totalorder %s37_s5, 0  ;;  %s65_s30 = sor.u32 %s64_s6, %s37_s5 }
  0x46   : > { %p66_p5 = scmp.eq.s32.totalorder %s65_s30, 0  ;;  %s163_s29 = sadd.s32 %s677_s4, %s662_s21 }
  0x47   : > { %s1181_s0 = scalar_select %p38_p4, %s959_s14, %s40_s23  }
  0x48   : > { %s1184_s24 = scalar_select %p66_p5, %s947_s11, %s68_s25  }
  0x49   : > { %s156_s28 = scalar_lea.vmem [#allocation6], %s660_s3  ;;  %s664_s17 = sshll.u32 %s163_s29, 6 }
  0x4a   : > { %s166_s12 = sshll.u32 %s156_s28, 4  ;;  %s1191_s16 = scalar_lea.hbm %s1359_s1, %s664_s17  ;;  %s1186_s12 = int_to_ptr.vmem [resolvable:$true] %s166_s12 }
  0x4b   : > { %p1394_p3 = scmp.lt.s32.totalorder %s979_s19, 4  ;;  %s1201_s28 = scalar_lea.sflag [#allocation7], %s152_s9 }
  0x4c   : > { %s823_s30 = scalar_lea.hbm %s1191_s16, 2048  ;;  %s828_s27 = scalar_lea.hbm %s1359_s1, 8192 }
  0x4d   : > { %p1197_p10 = pnand %p1394_p3, %p1161_p7  ;;  %p824_p1 = scmp.ne.s32.totalorder %s1191_s16, %s823_s30 }
  0x4e   : > { %p829_p2 = scmp.lt.u32.totalorder %s1191_s16, %s1359_s1  ;;  %p830_p11 = scmp.lt.u32.totalorder %s828_s27, %s823_s30 }
  0x4f   : > { %p825_p6 = pneg %p1197_p10  ;;  %p832_p12 = scmp.lt.u32.totalorder %s823_s30, %s1191_s16 }
  0x50   : > { %p831_p7 = por %p830_p11, %p829_p2 }
  0x51   : > { %p826_p9 = pnand %p825_p6, %p824_p1 }
  0x52   : > { %p833_p4 = por %p832_p12, %p831_p7 }
  0x53   : > { %p827_p13 = pneg %p826_p9 }
  0x55   : > { %p834_p5 = pnand %p833_p4, %p827_p13 }
  0x57   : > { %837 = shalt.err (!%p834_p5)
}
  0x58   : > { %s838_s25 = scalar_lea.vmem %s1186_s12, 2048  ;;  %s984_s6 = smov [#allocation6]  }
  0x59   : > { %p839_p3 = scmp.ne.s32.totalorder %s1186_s12, %s838_s25  ;;  %s843_s8 = sshll.u32 %s984_s6, 4  ;;  %s844_s8 = int_to_ptr.vmem [resolvable:$false] %s843_s8 }
  0x5a   : > { %s845_s9 = scalar_lea.vmem %s844_s8, 4096  ;;  %p846_p0 = scmp.lt.s32.totalorder %s1186_s12, %s844_s8 }
  0x5b   : > { %p841_p1 = pnand %p839_p3, %p825_p6  ;;  %p847_p2 = scmp.lt.s32.totalorder %s845_s9, %s838_s25 }
  0x5d   : > { %p842_p9 = pneg %p841_p1  ;;  %p848_p11 = por %p847_p2, %p846_p0 }
  0x5f   : > { %p849_p7 = pnand %p848_p11, %p842_p9 }
  0x61   : > { %852 = shalt.err (!%p849_p7)
}
  0x62   : > { %s985_s21 = smov 256   ;;  %s1396_s3 = smov 8  }
  0x63   : > { %s1397_s5 = smov 128   ;;  %178 = sbr.rel (%p1142_p8) target bundleno = 544 (0x220), region = 28 }
  0x64   : > { %692 = dma.hbm_to_vmem [thread:$0]  (!%p1197_p10), %s1191_s16, 2048, %s1186_s12, %s1201_s28, %s985_s21, %s1397_s5, %s1396_s3  }
  0x65   : > { %s1234_s30 = sand.u32 (!%p1142_p8), 1, %s955_s13   ;;  %p1398_p0 = scmp.ne.s32.totalorder (!%p1142_p8), %s1382_s26, 0 }
  0x66   : > { %s666_s2 = sshll.u32 (!%p1142_p8), %s1234_s30, 7  ;;  %s181_s17 = scalar_lea.sflag (!%p1142_p8), [#allocation4], %s1234_s30 }
  0x67   : > { %s1238_s27 = scalar_lea.vmem (!%p1142_p8), [#allocation3], %s666_s2 }
  0x6a   : > { %926 = dma.done.wait (%p1398_p0), %s181_s17, 2048  }
  0x6b   : > { %928 = vsyncadd (%p1398_p0), %s181_s17, 4294965248  ;;  %s189_s12 = sand.u32 1, %s943_s10   ;;  %p1399_p8 = scmp.ne.s32.totalorder %s1393_s20, 0 }
  0x6c   : > { %s667_s16 = sshll.u32 %s189_s12, 7  ;;  %s190_s7 = scalar_lea.sflag [#allocation7], %s189_s12 }
  0x6d   : > { %s1245_s23 = scalar_lea.vmem [#allocation6], %s667_s16 }
  0x6e   : > { %930 = dma.done.wait (%p1399_p8), %s190_s7, 2048  }
  0x6f   : > { %932 = vsyncadd (%p1399_p8), %s190_s7, 4294965248  ;;  %s668_s26 = sshll.u32 %s1234_s30, 3  ;;  %v222_v0 = vld [vmem:[%s1245_s23] sm:$0xff]   ;;  %v223_v1 = vld [vmem:[%s1245_s23 + $0x8] sm:$0xff]   ;;  %p669_p10 = scmp.ne.s32.totalorder %s963_s15, 0 }
  0x70   : > { %v224_v2 = vld [vmem:[%s1245_s23 + $0x10] sm:$0xff]   ;;  %v225_v3 = vld [vmem:[%s1245_s23 + $0x18] sm:$0xff]   ;;  %v226_v4 = vld [vmem:[%s1245_s23 + $0x20] sm:$0xff]   ;;  %v238_v6 = vunpack.c.l.bf16 %v222_v0  ;;  %v239_v7 = vunpack.c.l.bf16 %v223_v1  ;;  %v270_v9 = vunpack.c.h.bf16 %v222_v0  ;;  %v271_v16 = vunpack.c.h.bf16 %v223_v1  ;;  %s1272_s20 = scalar_lea.vmem [#allocation8], %s668_s26 }
  0x71   : > { %v227_v5 = vld [vmem:[%s1245_s23 + $0x28] sm:$0xff]   ;;  %v240_v8 = vunpack.c.l.bf16 %v224_v2  ;;  %v228_v10 = vld [vmem:[%s1245_s23 + $0x30] sm:$0xff]   ;;  %v229_v11 = vld [vmem:[%s1245_s23 + $0x38] sm:$0xff]   ;;  %v241_v13 = vunpack.c.l.bf16 %v225_v3  ;;  %v242_v14 = vunpack.c.l.bf16 %v226_v4  ;;  %v272_v23 = vunpack.c.h.bf16 %v224_v2 }
  0x72   : > { %v230_v12 = vld [vmem:[%s1245_s23 + $0x40] sm:$0xff]   ;;  %v243_v15 = vunpack.c.l.bf16 %v227_v5  ;;  %v231_v17 = vld [vmem:[%s1245_s23 + $0x48] sm:$0xff]   ;;  %v232_v18 = vld [vmem:[%s1245_s23 + $0x50] sm:$0xff]   ;;  %v244_v20 = vunpack.c.l.bf16 %v228_v10  ;;  %v245_v21 = vunpack.c.l.bf16 %v229_v11  ;;  %v273_v30 = vunpack.c.h.bf16 %v225_v3 }
  0x73   : > { %v233_v19 = vld [vmem:[%s1245_s23 + $0x58] sm:$0xff]   ;;  %v246_v22 = vunpack.c.l.bf16 %v230_v12  ;;  %v234_v24 = vld [vmem:[%s1245_s23 + $0x60] sm:$0xff]   ;;  %v235_v25 = vld [vmem:[%s1245_s23 + $0x68] sm:$0xff]   ;;  %v247_v27 = vunpack.c.l.bf16 %v231_v17  ;;  %v248_v28 = vunpack.c.l.bf16 %v232_v18  ;;  %v274_v35 = vunpack.c.h.bf16 %v226_v4 }
  0x74   : > { %v236_v26 = vld [vmem:[%s1245_s23 + $0x70] sm:$0xff]   ;;  %v249_v29 = vunpack.c.l.bf16 %v233_v19  ;;  %v237_v31 = vld [vmem:[%s1245_s23 + $0x78] sm:$0xff]   ;;  %v250_v32 = vunpack.c.l.bf16 %v234_v24  ;;  %v251_v33 = vunpack.c.l.bf16 %v235_v25  ;;  %v275_v37 = vunpack.c.h.bf16 %v227_v5 }
  0x75   : > { %v252_v34 = vunpack.c.l.bf16 %v236_v26  ;;  %v253_v36 = vunpack.c.l.bf16 %v237_v31  ;;  %v276_v38 = vunpack.c.h.bf16 %v228_v10  ;;  %v277_v39 = vunpack.c.h.bf16 %v229_v11  ;;  %305 = sbr.rel (%p669_p10) target bundleno = 131 (0x83), region = 40 }
  0x76   : > { %v278_v40 = vunpack.c.h.bf16 %v230_v12  ;;  %v279_v41 = vunpack.c.h.bf16 %v231_v17  ;;  %v280_v42 = vunpack.c.h.bf16 %v232_v18  ;;  %v281_v43 = vunpack.c.h.bf16 %v233_v19 }
  0x77   : > { %v282_v44 = vunpack.c.h.bf16 %v234_v24  ;;  %v283_v45 = vunpack.c.h.bf16 %v235_v25  ;;  %v284_v46 = vunpack.c.h.bf16 %v236_v26  ;;  %v285_v47 = vunpack.c.h.bf16 %v237_v31 }
  0x78   : > { %v286_v48 = vadd.f32 %v270_v9, %v238_v6  ;;  %v287_v49 = vadd.f32 %v271_v16, %v239_v7  ;;  %v288_v50 = vadd.f32 %v272_v23, %v240_v8  ;;  %v289_v51 = vadd.f32 %v273_v30, %v241_v13 }
  0x79   : > { %v290_v52 = vadd.f32 %v274_v35, %v242_v14  ;;  %v291_v53 = vadd.f32 %v275_v37, %v243_v15  ;;  %v292_v54 = vadd.f32 %v276_v38, %v244_v20  ;;  %v293_v55 = vadd.f32 %v277_v39, %v245_v21 }
  0x7a   : > { %v294_v56 = vadd.f32 %v278_v40, %v246_v22  ;;  %v295_v57 = vadd.f32 %v279_v41, %v247_v27  ;;  %v296_v58 = vadd.f32 %v280_v42, %v248_v28  ;;  %v297_v59 = vadd.f32 %v281_v43, %v249_v29  ;;  %306 = vst [vmem:[#allocation2] sm:$0xff] (!%p669_p10), %v286_v48 }
  0x7b   : > { %v298_v60 = vadd.f32 %v282_v44, %v250_v32  ;;  %v299_v61 = vadd.f32 %v283_v45, %v251_v33  ;;  %v300_v62 = vadd.f32 %v284_v46, %v252_v34  ;;  %v1268_v63 = vadd.f32 %v285_v47, %v253_v36  ;;  %307 = vst [vmem:[#allocation2 + $0x8] sm:$0xff] (!%p669_p10), %v287_v49 }
  0x7c   : > { %308 = vst [vmem:[#allocation2 + $0x10] sm:$0xff] %v288_v50  ;;  %309 = vst [vmem:[#allocation2 + $0x18] sm:$0xff] %v289_v51 }
  0x7d   : > { %310 = vst [vmem:[#allocation2 + $0x20] sm:$0xff] %v290_v52  ;;  %311 = vst [vmem:[#allocation2 + $0x28] sm:$0xff] %v291_v53 }
  0x7e   : > { %312 = vst [vmem:[#allocation2 + $0x30] sm:$0xff] %v292_v54  ;;  %313 = vst [vmem:[#allocation2 + $0x38] sm:$0xff] %v293_v55 }
  0x7f   : > { %314 = vst [vmem:[#allocation2 + $0x40] sm:$0xff] %v294_v56  ;;  %315 = vst [vmem:[#allocation2 + $0x48] sm:$0xff] %v295_v57 }
  0x80   : > { %316 = vst [vmem:[#allocation2 + $0x50] sm:$0xff] %v296_v58  ;;  %317 = vst [vmem:[#allocation2 + $0x58] sm:$0xff] %v297_v59 }
  0x81   : > { %318 = vst [vmem:[#allocation2 + $0x60] sm:$0xff] %v298_v60  ;;  %319 = vst [vmem:[#allocation2 + $0x68] sm:$0xff] %v299_v61 }
  0x82   : > { %320 = vst [vmem:[#allocation2 + $0x70] sm:$0xff] %v300_v62  ;;  %321 = vst [vmem:[#allocation2 + $0x78] sm:$0xff] %v1268_v63 }
  0x83 PF: > { %p670_p6 = scmp.le.s32.totalorder %s963_s15, 0 }
  0x84   : > { %v330_v7 = vld [vmem:[#allocation2 + $0x20] sm:$0xff] (!%p670_p6)  ;;  %v331_v8 = vld [vmem:[#allocation2 + $0x28] sm:$0xff] (!%p670_p6) }
  0x85   : > { %325 = sbr.rel (%p670_p6) target bundleno = 144 (0x90), region = 44  ;;  %v346_v10 = vadd.f32 (!%p670_p6), %v330_v7, %v290_v52  ;;  %v347_v11 = vadd.f32 (!%p670_p6), %v331_v8, %v291_v53  ;;  %v332_v12 = vld [vmem:[#allocation2 + $0x30] sm:$0xff] (!%p670_p6)  ;;  %v333_v13 = vld [vmem:[#allocation2 + $0x38] sm:$0xff] (!%p670_p6) }
  0x86   : > { %v334_v14 = vld [vmem:[#allocation2 + $0x40] sm:$0xff] (!%p670_p6)  ;;  %v348_v15 = vadd.f32 (!%p670_p6), %v332_v12, %v292_v54  ;;  %v349_v16 = vadd.f32 (!%p670_p6), %v333_v13, %v293_v55  ;;  %v335_v18 = vld [vmem:[#allocation2 + $0x48] sm:$0xff] (!%p670_p6) }
  0x87   : > { %v350_v17 = vadd.f32 (!%p670_p6), %v334_v14, %v294_v56  ;;  %v336_v19 = vld [vmem:[#allocation2 + $0x50] sm:$0xff] (!%p670_p6)  ;;  %v337_v20 = vld [vmem:[#allocation2 + $0x58] sm:$0xff] (!%p670_p6)  ;;  %362 = vst [vmem:[#allocation2 + $0x20] sm:$0xff] (!%p670_p6), %v346_v10  ;;  %363 = vst [vmem:[#allocation2 + $0x28] sm:$0xff] (!%p670_p6), %v347_v11  ;;  %v351_v21 = vadd.f32 (!%p670_p6), %v335_v18, %v295_v57 }
  0x88   : > { %v326_v0 = vld [vmem:[#allocation2] sm:$0xff] (!%p670_p6)  ;;  %v352_v22 = vadd.f32 (!%p670_p6), %v336_v19, %v296_v58  ;;  %v353_v23 = vadd.f32 (!%p670_p6), %v337_v20, %v297_v59  ;;  %v339_v25 = vld [vmem:[#allocation2 + $0x68] sm:$0xff] (!%p670_p6)  ;;  %364 = vst [vmem:[#allocation2 + $0x30] sm:$0xff] (!%p670_p6), %v348_v15  ;;  %365 = vst [vmem:[#allocation2 + $0x38] sm:$0xff] (!%p670_p6), %v349_v16 }
  0x89   : > { %v327_v1 = vld [vmem:[#allocation2 + $0x8] sm:$0xff] (!%p670_p6)  ;;  %v342_v3 = vadd.f32 (!%p670_p6), %v326_v0, %v286_v48  ;;  %v338_v24 = vld [vmem:[#allocation2 + $0x60] sm:$0xff] (!%p670_p6)  ;;  %v340_v26 = vld [vmem:[#allocation2 + $0x70] sm:$0xff] (!%p670_p6)  ;;  %366 = vst [vmem:[#allocation2 + $0x40] sm:$0xff] (!%p670_p6), %v350_v17  ;;  %v355_v28 = vadd.f32 (!%p670_p6), %v339_v25, %v299_v61 }
  0x8a   : > { %v328_v2 = vld [vmem:[#allocation2 + $0x10] sm:$0xff] (!%p670_p6)  ;;  %v343_v4 = vadd.f32 (!%p670_p6), %v327_v1, %v287_v49  ;;  %v329_v6 = vld [vmem:[#allocation2 + $0x18] sm:$0xff] (!%p670_p6)  ;;  %v354_v27 = vadd.f32 (!%p670_p6), %v338_v24, %v298_v60  ;;  %v356_v29 = vadd.f32 (!%p670_p6), %v340_v26, %v300_v62  ;;  %367 = vst [vmem:[#allocation2 + $0x48] sm:$0xff] (!%p670_p6), %v351_v21  ;;  %368 = vst [vmem:[#allocation2 + $0x50] sm:$0xff] (!%p670_p6), %v352_v22 }
  0x8b   : > { %v344_v5 = vadd.f32 (!%p670_p6), %v328_v2, %v288_v50  ;;  %v345_v9 = vadd.f32 (!%p670_p6), %v329_v6, %v289_v51  ;;  %358 = vst [vmem:[#allocation2] sm:$0xff] (!%p670_p6), %v342_v3  ;;  %v341_v30 = vld [vmem:[#allocation2 + $0x78] sm:$0xff] (!%p670_p6)  ;;  %369 = vst [vmem:[#allocation2 + $0x58] sm:$0xff] (!%p670_p6), %v353_v23 }
  0x8c   : > { %359 = vst [vmem:[#allocation2 + $0x8] sm:$0xff] %v343_v4  ;;  %v357_v31 = vadd.f32 %v341_v30, %v1268_v63  ;;  %370 = vst [vmem:[#allocation2 + $0x60] sm:$0xff] %v354_v27 }
  0x8d   : > { %360 = vst [vmem:[#allocation2 + $0x10] sm:$0xff] %v344_v5  ;;  %361 = vst [vmem:[#allocation2 + $0x18] sm:$0xff] %v345_v9 }
  0x8e   : > { %371 = vst [vmem:[#allocation2 + $0x68] sm:$0xff] %v355_v28  ;;  %372 = vst [vmem:[#allocation2 + $0x70] sm:$0xff] %v356_v29 }
  0x8f   : > { %373 = vst [vmem:[#allocation2 + $0x78] sm:$0xff] %v357_v31 }
  0x90 PF: > { %p671_p13 = scmp.ne.s32.totalorder %s963_s15, 1 }
  0x91   : > { %v396_v32 = vld [vmem:[%s1238_s27 + $0x10] sm:$0xff] (!%p671_p13)  ;;  %v394_v33 = vld [vmem:[%s1238_s27] sm:$0xff] (!%p671_p13)  ;;  %v986_v34 = vmov (!%p671_p13), 0   ;;  %v397_v35 = vld [vmem:[%s1238_s27 + $0x18] sm:$0xff] (!%p671_p13) }
  0x92   : > { %377 = sbr.rel (%p671_p13) target bundleno = 517 (0x205), region = 48  ;;  %792 = vset.pattern.permute.xlu1 (!%p671_p13), %v986_v34  ;;  %791 = vset.pattern.permute.xlu0 (!%p671_p13), %v986_v34  ;;  %v395_v36 = vld [vmem:[%s1238_s27 + $0x8] sm:$0xff] (!%p671_p13)  ;;  %v398_v38 = vld [vmem:[%s1238_s27 + $0x20] sm:$0xff] (!%p671_p13)  ;;  %v401_v39 = vld [vmem:[%s1238_s27 + $0x38] sm:$0xff] (!%p671_p13) }
  0x93   : > { %422 = vperm.xlu1 (!%p671_p13), %792, %v396_v32   ;;  %412 = vperm.xlu0 (!%p671_p13), %791, %v394_v33   ;;  %v399_v37 = vld [vmem:[%s1238_s27 + $0x28] sm:$0xff] (!%p671_p13)  ;;  %v400_v40 = vld [vmem:[%s1238_s27 + $0x30] sm:$0xff] (!%p671_p13)  ;;  %v402_v42 = vld [vmem:[%s1238_s27 + $0x40] sm:$0xff] (!%p671_p13) }
  0x94   : > { %v403_v41 = vld [vmem:[%s1238_s27 + $0x48] sm:$0xff] (!%p671_p13)  ;;  %v405_v43 = vld [vmem:[%s1238_s27 + $0x58] sm:$0xff] (!%p671_p13)  ;;  %v404_v44 = vld [vmem:[%s1238_s27 + $0x50] sm:$0xff] (!%p671_p13) }
  0x95   : > { %v407_v45 = vld [vmem:[%s1238_s27 + $0x68] sm:$0xff] (!%p671_p13)  ;;  %v406_v46 = vld [vmem:[%s1238_s27 + $0x60] sm:$0xff] (!%p671_p13)  ;;  %v409_v47 = vld [vmem:[%s1238_s27 + $0x78] sm:$0xff] (!%p671_p13) }
  0x96   : > { %v408_v48 = vld [vmem:[%s1238_s27 + $0x70] sm:$0xff] (!%p671_p13)  ;;  %v378_v51 = vld [vmem:[#allocation2] sm:$0xff] (!%p671_p13)  ;;  %v381_v58 = vld [vmem:[#allocation2 + $0x18] sm:$0xff] (!%p671_p13) }
  0x97   : > { %427 = vperm.xlu1 (!%p671_p13), %792, %v397_v35   ;;  %417 = vperm.xlu0 (!%p671_p13), %791, %v395_v36   ;;  %v379_v52 = vld [vmem:[#allocation2 + $0x8] sm:$0xff] (!%p671_p13)  ;;  %v380_v53 = vld [vmem:[#allocation2 + $0x10] sm:$0xff] (!%p671_p13)  ;;  %v382_v63 = vld [vmem:[#allocation2 + $0x20] sm:$0xff] (!%p671_p13) }
  0x98   : > { %v383_v2 = vld [vmem:[#allocation2 + $0x28] sm:$0xff] (!%p671_p13)  ;;  %v384_v7 = vld [vmem:[#allocation2 + $0x30] sm:$0xff] (!%p671_p13)  ;;  %v385_v10 = vld [vmem:[#allocation2 + $0x38] sm:$0xff] (!%p671_p13) }
  0x99   : > { %v386_v15 = vld [vmem:[#allocation2 + $0x40] sm:$0xff]  ;;  %v387_v18 = vld [vmem:[#allocation2 + $0x48] sm:$0xff]  ;;  %v388_v23 = vld [vmem:[#allocation2 + $0x50] sm:$0xff] }
  0x9a   : > { %v389_v26 = vld [vmem:[#allocation2 + $0x58] sm:$0xff]  ;;  %v390_v31 = vld [vmem:[#allocation2 + $0x60] sm:$0xff]  ;;  %v391_v34 = vld [vmem:[#allocation2 + $0x68] sm:$0xff] }
  0x9b   : > { %437 = vperm.xlu1 %792, %v399_v37   ;;  %432 = vperm.xlu0 %791, %v398_v38   ;;  %v392_v38 = vld [vmem:[#allocation2 + $0x70] sm:$0xff] }
  0x9f   : > { %447 = vperm.xlu1 %792, %v401_v39   ;;  %442 = vperm.xlu0 %791, %v400_v40  }
  0xa3   : > { %457 = vperm.xlu1 %792, %v403_v41   ;;  %452 = vperm.xlu0 %791, %v402_v42   ;;  %v393_v42 = vld [vmem:[#allocation2 + $0x78] sm:$0xff] }
  0xa7   : > { %467 = vperm.xlu1 %792, %v405_v43   ;;  %462 = vperm.xlu0 %791, %v404_v44  }
  0xab   : > { %477 = vperm.xlu1 %792, %v407_v45   ;;  %472 = vperm.xlu0 %791, %v406_v46  }
  0xaf   : > { %487 = vperm.xlu1 %792, %v409_v47   ;;  %482 = vperm.xlu0 %791, %v408_v48  }
 0x112   : > { %v423_v49 = vpop.permute.xlu1 %422  ;;  %v413_v50 = vpop.permute.xlu0 %412 }
 0x113   : > { %v490_v56 = vmul.f32 %v413_v50, %v378_v51  ;;  %v492_v59 = vmul.f32 %v423_v49, %v380_v53 }
 0x116   : > { %v428_v54 = vpop.permute.xlu1 %427  ;;  %v418_v55 = vpop.permute.xlu0 %417 }
 0x117   : > { %v491_v57 = vmul.f32 %v418_v55, %v379_v52  ;;  %v493_v0 = vmul.f32 %v428_v54, %v381_v58 }
 0x119   : > { %v506_v60 = vadd.f32 %v491_v57, %v490_v56 }
 0x11a   : > { %v438_v61 = vpop.permute.xlu1 %437  ;;  %v433_v62 = vpop.permute.xlu0 %432 }
 0x11b   : > { %v507_v1 = vadd.f32 %v506_v60, %v492_v59  ;;  %v494_v3 = vmul.f32 %v433_v62, %v382_v63  ;;  %v495_v8 = vmul.f32 %v438_v61, %v383_v2 }
 0x11d   : > { %v508_v4 = vadd.f32 %v507_v1, %v493_v0 }
 0x11e   : > { %v448_v5 = vpop.permute.xlu1 %447  ;;  %v443_v6 = vpop.permute.xlu0 %442 }
 0x11f   : > { %v509_v9 = vadd.f32 %v508_v4, %v494_v3  ;;  %v496_v11 = vmul.f32 %v443_v6, %v384_v7  ;;  %v497_v16 = vmul.f32 %v448_v5, %v385_v10 }
 0x121   : > { %v510_v12 = vadd.f32 %v509_v9, %v495_v8 }
 0x122   : > { %v458_v13 = vpop.permute.xlu1 %457  ;;  %v453_v14 = vpop.permute.xlu0 %452 }
 0x123   : > { %v511_v17 = vadd.f32 %v510_v12, %v496_v11  ;;  %v498_v19 = vmul.f32 %v453_v14, %v386_v15  ;;  %v499_v24 = vmul.f32 %v458_v13, %v387_v18 }
 0x125   : > { %v512_v20 = vadd.f32 %v511_v17, %v497_v16 }
 0x126   : > { %v468_v21 = vpop.permute.xlu1 %467  ;;  %v463_v22 = vpop.permute.xlu0 %462 }
 0x127   : > { %v513_v25 = vadd.f32 %v512_v20, %v498_v19  ;;  %v500_v27 = vmul.f32 %v463_v22, %v388_v23  ;;  %v501_v32 = vmul.f32 %v468_v21, %v389_v26 }
 0x129   : > { %v514_v28 = vadd.f32 %v513_v25, %v499_v24 }
 0x12a   : > { %v478_v29 = vpop.permute.xlu1 %477  ;;  %v473_v30 = vpop.permute.xlu0 %472 }
 0x12b   : > { %v515_v33 = vadd.f32 %v514_v28, %v500_v27  ;;  %v502_v35 = vmul.f32 %v473_v30, %v390_v31  ;;  %v503_v39 = vmul.f32 %v478_v29, %v391_v34 }
 0x12d   : > { %v516_v36 = vadd.f32 %v515_v33, %v501_v32 }
 0x12e   : > { %v483_v37 = vpop.permute.xlu0 %482  ;;  %v488_v41 = vpop.permute.xlu1 %487 }
 0x12f   : > { %v517_v40 = vadd.f32 %v516_v36, %v502_v35  ;;  %v504_v43 = vmul.f32 %v483_v37, %v392_v38  ;;  %v505_v45 = vmul.f32 %v488_v41, %v393_v42 }
 0x131   : > { %v518_v44 = vadd.f32 %v517_v40, %v503_v39 }
 0x133   : > { %v519_v46 = vadd.f32 %v518_v44, %v504_v43 }
 0x135   : > { %v520_v47 = vadd.f32 %v519_v46, %v505_v45 }
 0x137   : > { %521 = vadd.xlane.f32.xlu0 %v520_v47 }
 0x1c4   : > { %v522_v48 = vpop.xlane.xlu0 %521 }
 0x1c5   : > { %v523_v49 = vrot.slane %v522_v48, 4 }
 0x1c7   : > { %v524_v50 = vadd.f32 %v523_v49, %v522_v48 }
 0x1c9   : > { %v525_v51 = vrot.slane %v524_v50, 2 }
 0x1cb   : > { %v526_v52 = vadd.f32 %v525_v51, %v524_v50 }
 0x1cd   : > { %v527_v53 = vrot.slane %v526_v52, 1 }
 0x1cf   : > { %v528_v54 = vadd.f32 %v527_v53, %v526_v52 }
 0x1d1   : > { %678 = vpush %v528_v54 }
 0x202   : > { %s679_s15 = spop %678 }
 0x203   : > { %v530_v55 = vstv %s679_s15 }
 0x204   : > { %531 = vst [vmem:[%s1272_s20] sm:$0xff] %v530_v55 }
 0x205 PF: > { %s1400_s28 = sld [smem:[#allocation13_spill]]  ;;  %s1401_s4 = sld [smem:[#allocation15_spill]] }
 0x206   : > { %s1402_s8 = sld [smem:[#allocation19_spill]]  ;;  %s546_s21 = sshll.u32 %s1272_s20, 4  ;;  %s547_s21 = int_to_ptr.vmem [resolvable:$true] %s546_s21 }
 0x207   : > { %s533_s3 = scalar_lea.sflag [#allocation5], %s1234_s30  ;;  %s853_s5 = scalar_lea.vmem %s547_s21, 128 }
 0x208   : > { %p854_p12 = scmp.ne.s32.totalorder %s547_s21, %s853_s5  ;;  %s987_s2 = smov [#allocation8]  }
 0x209   : > { %s857_s17 = sshll.u32 %s987_s2, 4  ;;  %s858_s17 = int_to_ptr.vmem [resolvable:$false] %s857_s17 }
 0x20a   : > { %s859_s27 = scalar_lea.vmem %s858_s17, 256  ;;  %p860_p1 = scmp.lt.s32.totalorder %s547_s21, %s858_s17 }
 0x20b   : > { %s673_s29 = sshll.u32 %s1400_s28, 7  ;;  %p1403_p4 = scmp.ne.s32.totalorder %s1401_s4, 0 }
 0x20c   : > { %s1300_s9 = scalar_lea.hbm %s1402_s8, %s673_s29  ;;  %p861_p9 = scmp.lt.s32.totalorder %s859_s27, %s853_s5 }
 0x20d   : > { %p855_p5 = pnand %p854_p12, %p1403_p4 }
 0x20e   : > { %p862_p2 = por %p861_p9, %p860_p1 }
 0x20f   : > { %p856_p3 = pneg %p855_p5 }
 0x211   : > { %p863_p11 = pnand %p862_p2, %p856_p3 }
 0x213   : > { %866 = shalt.err (!%p863_p11)
}
 0x214   : > { %s867_s30 = scalar_lea.hbm %s1300_s9, 128  ;;  %s871_s7 = scalar_lea.hbm %s1402_s8, 256 }
 0x215   : > { %p868_p7 = scmp.ne.s32.totalorder %s1300_s9, %s867_s30  ;;  %p872_p10 = scmp.lt.u32.totalorder %s1300_s9, %s1402_s8 }
 0x216   : > { %p873_p6 = scmp.lt.u32.totalorder %s871_s7, %s867_s30  ;;  %p875_p12 = scmp.lt.u32.totalorder %s867_s30, %s1300_s9 }
 0x217   : > { %p869_p0 = pnand %p868_p7, %p1403_p4 }
 0x218   : > { %p874_p13 = por %p873_p6, %p872_p10 }
 0x219   : > { %p870_p8 = pneg %p869_p0 }
 0x21a   : > { %p876_p5 = por %p875_p12, %p874_p13 }
 0x21c   : > { %p877_p3 = pnand %p876_p5, %p870_p8 }
 0x21e   : > { %880 = shalt.err (!%p877_p3)
}
 0x21f   : > { %684 = dma.vmem_to_hbm [thread:$0]  (%p1403_p4), %s547_s21, 128, %s1300_s9, %s533_s3  }
 0x220 PF: > { %s1404_s20 = sld [smem:[#allocation12_spill]]  ;;  %s1405_s15 = sld [smem:[#allocation16_spill]] }
 0x221   : > { %p698_p1 = scmp.ge.s32.totalorder %s979_s19, 2 }
 0x226   : > { %s558_s28 = sand.u32 1, %s1404_s20   ;;  %p1406_p9 = scmp.ne.s32.totalorder %s1405_s15, 0 }
 0x227   : > { %s559_s29 = scalar_lea.sflag [#allocation5], %s558_s28 }
 0x228   : > { %p694_p2 = pnand %p698_p1, %p1406_p9 }
 0x22a   : > { %934 = dma.done.wait (!%p694_p2), %s559_s29, 128  }
 0x22b   : > { %936 = vsyncadd (!%p694_p2), %s559_s29, 4294967168  ;;  %s21_s19 = sadd.s32 1, %s979_s19   ;;  %s1407_s15 = sld [smem:[#allocation14_spill]] }
 0x22c   : > { %p18_p11 = scmp.ge.s32.totalorder %s21_s19, 6   ;;  %s1408_s17 = sld [smem:[#allocation17_spill]] }
 0x22d   : > { %s1409_s9 = smov %s943_s10  ;;  %s1410_s10 = smov %s947_s11 }
 0x22e   : > { %s1411_s11 = smov %s1184_s24  ;;  %s1412_s12 = smov %s955_s13 }
 0x22f   : > { %s1413_s13 = smov %s959_s14  ;;  %s1414_s14 = smov %s1181_s0 }
 0x230   : > { %s1415_s16 = smov %s975_s18  ;;  %s1416_s18 = smov %s1422_s22 }
 0x231   :  { %20 = sbr.rel (!%p18_p11) target bundleno = 14 (0xe), region = 98 }
 0x238   :  { %564 = vsyncpa [#allocation4], 1 }
 0x239   :  { %566 = vsyncpa [#allocation4 + $0x1], 1 }
 0x23a   :  { %567 = vsyncpa [#allocation7], 1 }
 0x23b   :  { %569 = vsyncpa [#allocation7 + $0x1], 1 }
 0x23c   :  { %570 = vsyncpa [#allocation5], 1 }
 0x23d   :  { %572 = vsyncpa [#allocation5 + $0x1], 1 }

</bundles_post_ra>
